<compile_context>
chip_gen: v7x
topology: tpu7x:2x2x1
jax: 0.10.0
libtpu: 0.0.40
codegen_flags: <defaults>
</compile_context>

<pallas_src>
import functools

import jax
import jax.numpy as jnp
from jax import lax
from jax.experimental import pallas as pl
from jax.experimental.pallas import tpu as pltpu

_LANES = 128
_DEFAULT_MAX_BLOCK_ROWS = 4096                  # (4096, 128) f32 block = 2 MiB
_PER_STEP_INPUT_BYTE_BUDGET = 8 * 1024 * 1024   # all K double-buffered input blocks
_VMEM_LIMIT_BYTES = 32 * 1024 * 1024            # scoped VMEM; safe on v5e/v6e/v7x


def _gan_mse_kernel(*refs, k, rt, bpc, acc_rows, target, valid_rows, needs_mask):
    """refs = (pred_0, ..., pred_{k-1}, out).

    pred_i : (rt, 128) VMEM tile of the i-th flattened prediction (native dtype)
    out    : (acc_rows, 128) f32 per-core partial-sum block; its block index is
             constant along the reduction axis, so it stays resident in VMEM.
    """
    pred_refs = refs[:k]
    out_ref = refs[k]
    c = pl.program_id(0)          # core-split axis ("parallel")
    i = pl.program_id(1)          # row-block reduction axis ("arbitrary")

    @pl.when(i == 0)
    def _init():
        out_ref[...] = jnp.zeros_like(out_ref)

    # Sum the K stacked predictions (unrolled VPU adds), fold the mean's 1/K
    # into a single multiply, subtract the scalar target, square.
    s = pred_refs[0][...].astype(jnp.float32)
    for r in pred_refs[1:]:
        s = s + r[...].astype(jnp.float32)
    if k > 1:
        s = s * (1.0 / k)
    diff = s - target
    sq = diff * diff

    def _partial_sum(x):
        # (rt, 128) -> (acc_rows, 128) via sublane-group vreg adds (pure VPU).
        if acc_rows == rt:
            return x
        return x.reshape(rt // acc_rows, acc_rows, _LANES).sum(axis=0)

    if not needs_mask:
        out_ref[...] += _partial_sum(sq)
    else:
        row0 = (c * bpc + i) * rt          # first (unclamped) global row
        is_full = row0 + rt <= valid_rows  # traced scalar predicate

        @pl.when(is_full)
        def _full_block():                 # steady state: no mask cost
            out_ref[...] += _partial_sum(sq)

        @pl.when(jnp.logical_not(is_full))
        def _boundary_block():             # only the ragged / phantom blocks
            rows_idx = row0 + lax.broadcasted_iota(jnp.int32, sq.shape, 0)
            # Select (not multiply-by-mask): out-of-range rows may hold stale
            # NaN/Inf VMEM garbage.
            masked = jnp.where(rows_idx < valid_rows, sq, 0.0)
            out_ref[...] += _partial_sum(masked)


def _gan_mse_pallas(mats, target, numel, max_block_rows=_DEFAULT_MAX_BLOCK_ROWS):
    """mats: list of K (rows, 128) arrays (native dtype), identical shapes.
    target: python float (0.0 or 1.0).  numel: true (unpadded) element count."""
    k = len(mats)
    rows = mats[0].shape[0]

    # Dtype-aware block-row budget (bf16 gets 2x the rows of f32 for the same
    # bytes), rounded to the sublane packing of the input dtype.
    itemsize = max(jnp.dtype(m.dtype).itemsize for m in mats)
    sublane_pack = max(8, 32 // itemsize)      # 8 f32, 16 bf16, 32 int8/fp8
    budget_rows = _PER_STEP_INPUT_BYTE_BUDGET // (k * 2 * _LANES * itemsize)
    max_rows = min(int(max_block_rows), budget_rows)
    max_rows = max(sublane_pack, (max_rows // sublane_pack) * sublane_pack)

    if rows <= max_rows:
        rt = rows                  # single full-array block (exempt from /8 rule)
    else:
        rt = max_rows              # multiple of the sublane packing
    nb = -(-rows // rt)            # total row blocks
    nc = 2 if nb >= 2 else 1       # leading "parallel" axis: v7x 2-TC split
    bpc = -(-nb // nc)             # row blocks per core
    acc_rows = 8 if rt % 8 == 0 else rt
    needs_mask = (nc * bpc * rt) != rows

    kernel = functools.partial(
        _gan_mse_kernel, k=k, rt=rt, bpc=bpc, acc_rows=acc_rows,
        target=float(target), valid_rows=rows, needs_mask=needs_mask)

    def in_index_map(c, i):
        # Clamp: with an uneven core split the last core may be handed a fully
        # out-of-range block; re-read the last valid block and mask it to zero.
        return (jnp.minimum(c * bpc + i, nb - 1), 0)

    out = pl.pallas_call(
        kernel,
        out_shape=jax.ShapeDtypeStruct((nc * acc_rows, _LANES), jnp.float32),
        grid_spec=pltpu.PrefetchScalarGridSpec(
            num_scalar_prefetch=0,
            grid=(nc, bpc),
            in_specs=[pl.BlockSpec((rt, _LANES), in_index_map) for _ in range(k)],
            out_specs=pl.BlockSpec((acc_rows, _LANES), lambda c, i: (c, 0)),
        ),
        compiler_params=pltpu.CompilerParams(
            dimension_semantics=("parallel", "arbitrary"),
            vmem_limit_bytes=_VMEM_LIMIT_BYTES,
        ),
    )(*mats)
    # Per-core partial-sum slabs -> scalar MSE (tiny wrapper-side reduce).
    return jnp.sum(out) * (1.0 / float(numel))


def gan_loss_forward(x, target_is_real, max_block_rows=_DEFAULT_MAX_BLOCK_ROWS):
    """Mirrors GANLoss.forward. `x` is either a list of discriminator results
    (each indexable; last element = prediction map) or a single tensor."""
    target = 1.0 if target_is_real else 0.0
    if isinstance(x, (list, tuple)):
        preds = [d[-1] for d in x]          # last output of each discriminator
        shapes = {tuple(p.shape) for p in preds}
        if len(shapes) != 1:
            raise ValueError(
                "GANLoss list input requires identical prediction-map shapes "
                f"(stack-then-mean semantics); got {sorted(shapes)}")
    else:
        preds = [x[-1]]                     # torch-style x[-1]: slice along dim 0

    numel = preds[0].size
    flats = [p.reshape(-1) for p in preds]  # free reshape of contiguous maps
    pad = (-numel) % _LANES
    if pad:
        # Pad only the sub-128 lane tail, with the target value, so the padded
        # elements contribute exactly zero to the squared-error sum.
        # TODO(synk): the ragged (numel % 128 != 0) case still costs one HBM
        # copy of each prediction; removing it needs a 1-D-block + in-kernel
        # lane-mask path, which relies on fragile 1-D TPU layouts.
        flats = [jnp.pad(f, (0, pad), constant_values=target) for f in flats]
    rows = (numel + pad) // _LANES
    mats = [f.reshape(rows, _LANES) for f in flats]
    return _gan_mse_pallas(mats, target, numel, max_block_rows=max_block_rows)


def _ref_forward(x, target_is_real):
    """Pure-JAX reference of the PyTorch forward."""
    target = 1.0 if target_is_real else 0.0
    if isinstance(x, (list, tuple)):
        pred = jnp.mean(jnp.stack([d[-1] for d in x], axis=0).astype(jnp.float32), axis=0)
    else:
        pred = x[-1].astype(jnp.float32)
    return jnp.mean((pred - target) ** 2)


if __name__ == "__main__":
    key = jax.random.PRNGKey(0)
    keys = jax.random.split(key, 10)

    B, C, H, W = 2, 1, 16, 16  # PyTorch NCHW prediction maps

    # Multi-discriminator case: list of per-discriminator result lists;
    # the last element of each is the prediction map.
    disc1 = [jax.random.normal(keys[0], (B, 4, H, W), jnp.float32),
             jax.random.normal(keys[1], (B, C, H, W), jnp.float32)]
    disc2 = [jax.random.normal(keys[2], (B, 4, H, W), jnp.float32),
             jax.random.normal(keys[3], (B, C, H, W), jnp.float32)]
    x_list = [disc1, disc2]

    # Single-tensor case.
    x_tensor = jax.random.normal(keys[4], (B, C, H, W), jnp.float32)

    # Ragged-tail case (numel % 128 != 0) and native bf16 case.
    x_ragged = jax.random.normal(keys[5], (B, C, 10, 10), jnp.float32)
    x_bf16 = jax.random.normal(keys[6], (B, C, H, W), jnp.float32).astype(jnp.bfloat16)

    cases = [(x_list, True), (x_list, False), (x_tensor, True),
             (x_ragged, False), (x_bf16, True)]
    for x, is_real in cases:
        out = jax.block_until_ready(gan_loss_forward(x, is_real))
        ref = _ref_forward(x, is_real)
        assert jnp.allclose(out, ref, atol=1e-5, rtol=1e-5), (out, ref)

    # Multi-block, 2-core split, evenly divisible (static unmasked path).
    a_even = jax.random.normal(keys[7], (256, 128), jnp.float32)
    out = jax.block_until_ready(_gan_mse_pallas([a_even], 1.0, 256 * 128,
                                                max_block_rows=64))
    ref = jnp.mean((a_even - 1.0) ** 2)
    assert jnp.allclose(out, ref, atol=1e-5, rtol=1e-5), (out, ref)

    # Multi-block, 2-core split, ragged rows + fully out-of-range (clamped) block.
    a_odd = jax.random.normal(keys[8], (300, 128), jnp.float32)
    out = jax.block_until_ready(_gan_mse_pallas([a_odd], 0.0, 300 * 128,
                                                max_block_rows=64))
    ref = jnp.mean(a_odd ** 2)
    assert jnp.allclose(out, ref, atol=1e-5, rtol=1e-5), (out, ref)

    # bf16 multi-block path (16-row sublane packing, mask on phantom block only).
    a_bf = jax.random.normal(keys[9], (320, 128), jnp.float32).astype(jnp.bfloat16)
    out = jax.block_until_ready(_gan_mse_pallas([a_bf], 1.0, 320 * 128,
                                                max_block_rows=64))
    ref = jnp.mean((a_bf.astype(jnp.float32) - 1.0) ** 2)
    assert jnp.allclose(out, ref, atol=1e-5, rtol=1e-5), (out, ref)

    print("KERNEL_OK")
</pallas_src>

<mosaic_0001>
module attributes {stable_mosaic.version = 11 : i64} {
  func.func @_gan_mse_kernel(%arg0: i32, %arg1: i32, %arg2: memref<4x128xf32, #tpu.memory_space<vmem>>, %arg3: memref<4x128xf32, #tpu.memory_space<vmem>>, %arg4: memref<4x128xf32, #tpu.memory_space<vmem>>) attributes {dimension_semantics = [#tpu.dimension_semantics<parallel>, #tpu.dimension_semantics<arbitrary>], iteration_bounds = array<i64: 1, 1>, scalar_prefetch = 0 : i64, scratch_operands = 0 : i64, tpu.core_type = #tpu.core_type<tc>, window_params = [{transform_indices = @transform_0, window_bounds = array<i64: 4, 128>}, {transform_indices = @transform_1, window_bounds = array<i64: 4, 128>}, {transform_indices = @transform_2, window_bounds = array<i64: 4, 128>}]} {
    %c0_i32 = arith.constant 0 : i32
    %0 = arith.cmpi eq, %arg1, %c0_i32 : i32
    %1 = arith.extui %0 : i1 to i32
    %c0_i32_0 = arith.constant 0 : i32
    %2 = arith.cmpi ne, %1, %c0_i32_0 : i32
    scf.if %2 {
      %cst_9 = arith.constant 0.000000e+00 : f32
      %14 = vector.broadcast %cst_9 : f32 to vector<4x128xf32>
      %c0_10 = arith.constant 0 : index
      %c0_11 = arith.constant 0 : index
      %15 = vector.load %arg4[%c0_10, %c0_11] : memref<4x128xf32, #tpu.memory_space<vmem>>, vector<4x128xf32>
      tpu.vector_store %arg4[%c0_10, %c0_11], %14 {strides = array<i32>} : memref<4x128xf32, #tpu.memory_space<vmem>>, vector<4x128xf32>,
    } else {
    }
    %c0 = arith.constant 0 : index
    %c0_1 = arith.constant 0 : index
    %3 = vector.load %arg2[%c0, %c0_1] : memref<4x128xf32, #tpu.memory_space<vmem>>, vector<4x128xf32>
    %c0_2 = arith.constant 0 : index
    %c0_3 = arith.constant 0 : index
    %4 = vector.load %arg3[%c0_2, %c0_3] : memref<4x128xf32, #tpu.memory_space<vmem>>, vector<4x128xf32>
    %5 = arith.addf %3, %4 : vector<4x128xf32>
    %cst = arith.constant 5.000000e-01 : f32
    %6 = vector.broadcast %cst : f32 to vector<4x128xf32>
    %7 = arith.mulf %5, %6 : vector<4x128xf32>
    %cst_4 = arith.constant 1.000000e+00 : f32
    %8 = vector.broadcast %cst_4 : f32 to vector<4x128xf32>
    %9 = arith.subf %7, %8 : vector<4x128xf32>
    %10 = arith.mulf %9, %9 : vector<4x128xf32>
    %c0_5 = arith.constant 0 : index
    %c0_6 = arith.constant 0 : index
    %11 = vector.load %arg4[%c0_5, %c0_6] : memref<4x128xf32, #tpu.memory_space<vmem>>, vector<4x128xf32>
    %12 = arith.addf %11, %10 : vector<4x128xf32>
    %c0_7 = arith.constant 0 : index
    %c0_8 = arith.constant 0 : index
    %13 = vector.load %arg4[%c0_7, %c0_8] : memref<4x128xf32, #tpu.memory_space<vmem>>, vector<4x128xf32>
    tpu.vector_store %arg4[%c0_7, %c0_8], %12 {strides = array<i32>} : memref<4x128xf32, #tpu.memory_space<vmem>>, vector<4x128xf32>,
    return
  }
  func.func @transform_0(%arg0: i32, %arg1: i32) -> (i32, i32) {
    %c1_i32 = arith.constant 1 : i32
    %0 = arith.muli %arg0, %c1_i32 : i32
    %1 = arith.addi %0, %arg1 : i32
    %c0_i32 = arith.constant 0 : i32
    %2 = arith.minsi %1, %c0_i32 : i32
    %c0_i32_0 = arith.constant 0 : i32
    %c0_i32_1 = arith.constant 0 : i32
    return %2, %c0_i32_0 : i32, i32
  }
  func.func @transform_1(%arg0: i32, %arg1: i32) -> (i32, i32) {
    %c1_i32 = arith.constant 1 : i32
    %0 = arith.muli %arg0, %c1_i32 : i32
    %1 = arith.addi %0, %arg1 : i32
    %c0_i32 = arith.constant 0 : i32
    %2 = arith.minsi %1, %c0_i32 : i32
    %c0_i32_0 = arith.constant 0 : i32
    %c0_i32_1 = arith.constant 0 : i32
    return %2, %c0_i32_0 : i32, i32
  }
  func.func @transform_2(%arg0: i32, %arg1: i32) -> (i32, i32) {
    %c0_i32 = arith.constant 0 : i32
    %c0_i32_0 = arith.constant 0 : i32
    return %arg0, %c0_i32 : i32, i32
  }
}

</mosaic_0001>

<bundles_post_ra>
// kernel: tpu_custom_call.1
= control target key start
LH: loop header
LB: loop body
LE: loop exit
PB: predicated region body
PF: predicated region fallthrough
CT: control target
= control target key end

     0   :  { %7 = vsyncpa [#allocation3], 0  ;;  %s218_s0 = inlined_call_operand.hbm [shape: f32[4,128], index: 0, kind: input, shape index: {}]   ;;  %s219_s1 = inlined_call_operand.hbm [shape: f32[4,128], index: 1, kind: input, shape index: {}]   ;;  %s220_s2 = inlined_call_operand.hbm [shape: f32[4,128], index: 2, kind: output, shape index: {}]  }
   0x1   :  { %8 = vsyncpa [#allocation6], 0 }
   0x2   :  { %9 = vsyncpa [#allocation4], 0  ;;  %s163_s9 = smov [#allocation2]   ;;  %s164_s11 = smov [#allocation5]  }
   0x3   :  { %s21_s10 = sshll.u32 %s163_s9, 4  ;;  %s36_s12 = sshll.u32 %s164_s11, 4  ;;  %s22_s10 = int_to_ptr.vmem [resolvable:$true] %s21_s10  ;;  %s37_s12 = int_to_ptr.vmem [resolvable:$true] %s36_s12 }
   0x4   :  { %s91_s15 = scalar_lea.hbm %s218_s0, 64 }
   0x5   :  { %p92_p0 = scmp.ne.s32.totalorder %s218_s0, %s91_s15  ;;  %p95_p1 = scmp.lt.u32.totalorder %s91_s15, %s218_s0 }
   0x7   :  { %p97_p2 = pnand %p95_p1, %p92_p0 }
   0x9   :  { %100 = shalt.err (!%p97_p2)
}
   0xa   :  { %s101_s20 = scalar_lea.vmem %s22_s10, 64  ;;  %p106_p4 = scmp.lt.s32.totalorder %s22_s10, %s22_s10 }
   0xb   :  { %p102_p3 = scmp.ne.s32.totalorder %s22_s10, %s101_s20  ;;  %p107_p5 = scmp.lt.s32.totalorder %s101_s20, %s101_s20 }
   0xd   :  { %p108_p6 = por %p107_p5, %p106_p4 }
   0xf   :  { %p109_p7 = pnand %p108_p6, %p102_p3 }
  0x11   :  { %112 = shalt.err (!%p109_p7)
}
  0x12   :  { %24 = dma.hbm_to_vmem [thread:$0]  %s218_s0, 64, %s22_s10, [#allocation3]  }
  0x13   :  { %s113_s25 = scalar_lea.hbm %s219_s1, 64 }
  0x14   :  { %p114_p8 = scmp.ne.s32.totalorder %s219_s1, %s113_s25  ;;  %p117_p9 = scmp.lt.u32.totalorder %s113_s25, %s219_s1 }
  0x16   :  { %p119_p10 = pnand %p117_p9, %p114_p8 }
  0x18   :  { %122 = shalt.err (!%p119_p10)
}
  0x19   :  { %s123_s30 = scalar_lea.vmem %s37_s12, 64  ;;  %p128_p12 = scmp.lt.s32.totalorder %s37_s12, %s37_s12 }
  0x1a   :  { %p124_p11 = scmp.ne.s32.totalorder %s37_s12, %s123_s30  ;;  %p129_p13 = scmp.lt.s32.totalorder %s123_s30, %s123_s30 }
  0x1c   :  { %p130_p0 = por %p129_p13, %p128_p12 }
  0x1e   :  { %p131_p1 = pnand %p130_p0, %p124_p11 }
  0x20   :  { %134 = shalt.err (!%p131_p1)
}
  0x21   :  { %39 = dma.hbm_to_vmem [thread:$0]  %s219_s1, 64, %s37_s12, [#allocation6]  }
  0x22   :  { %157 = dma.done.wait [#allocation3], 64  }
  0x23   :  { %158 = vsyncadd [#allocation3], 4294967232 }
  0x24   :  { %159 = dma.done.wait [#allocation6], 64  }
  0x25   :  { %160 = vsyncadd [#allocation6], 4294967232  ;;  %v165_v0 = vmov 0.0   ;;  %v57_v1 = vld [vmem:[#allocation2] sm:$0xf]  ;;  %s166_s4 = smov [#allocation7]  }
  0x26   :  { %56 = vst [vmem:[#allocation7] sm:$0xf] %v165_v0  ;;  %v58_v2 = vld [vmem:[#allocation5] sm:$0xf]  ;;  %s72_s5 = sshll.u32 %s166_s4, 4  ;;  %s73_s5 = int_to_ptr.vmem [resolvable:$true] %s72_s5 }
  0x27   :  { %v59_v3 = vadd.f32 %v58_v2, %v57_v1  ;;  %s135_s6 = scalar_lea.vmem %s73_s5, 64  ;;  %p140_p3 = scmp.lt.s32.totalorder %s73_s5, %s73_s5 }
  0x28   :  { %p136_p2 = scmp.ne.s32.totalorder %s73_s5, %s135_s6  ;;  %p141_p4 = scmp.lt.s32.totalorder %s135_s6, %s135_s6 }
  0x29   :  { %v60_v4 = vmul.f32 0.5, %v59_v3 }
  0x2a   :  { %p142_p5 = por %p141_p4, %p140_p3 }
  0x2b   :  { %v86_v5 = vadd.f32 -1.0, %v60_v4 }
  0x2c   :  { %p143_p6 = pnand %p142_p5, %p136_p2 }
  0x2d   :  { %v63_v6 = vld [vmem:[#allocation7] sm:$0xf]  ;;  %v62_v7 = vmul.f32 %v86_v5, %v86_v5 }
  0x2f   :  { %v64_v8 = vadd.f32 %v63_v6, %v62_v7 }
  0x31   :  { %65 = vst [vmem:[#allocation7] sm:$0xf] %v64_v8 }
  0x32   :  { %146 = shalt.err (!%p143_p6)
}
  0x33   :  { %s147_s8 = scalar_lea.hbm %s220_s2, 64 }
  0x34   :  { %p148_p7 = scmp.ne.s32.totalorder %s220_s2, %s147_s8  ;;  %p151_p8 = scmp.lt.u32.totalorder %s147_s8, %s220_s2 }
  0x36   :  { %p153_p9 = pnand %p151_p8, %p148_p7 }
  0x38   :  { %156 = shalt.err (!%p153_p9)
}
  0x39   :  { %75 = dma.vmem_to_hbm [thread:$0]  %s73_s5, 64, %s220_s2, [#allocation4]  }
  0x3a   :  { %161 = dma.done.wait [#allocation4], 64  }
  0x3b   :  { %162 = vsyncadd [#allocation4], 4294967232 }
  0x3c   :  { %79 = vsyncpa [#allocation3], 1 }
  0x3d   :  { %80 = vsyncpa [#allocation6], 1 }
  0x3e   :  { %81 = vsyncpa [#allocation4], 1 }

</bundles_post_ra>
